<compile_context>
chip_gen: v7x
topology: tpu7x:2x2x1
jax: 0.10.0
libtpu: 0.0.40
codegen_flags: <defaults>
</compile_context>

<pallas_src>
import functools

import jax
import jax.numpy as jnp
from jax.experimental import pallas as pl
from jax.experimental.pallas import tpu as pltpu


def _gdl_kernel(y_pred_ref, y_true_ref, out_ref,
                inter_acc, psum_acc, csum_acc,
                *, smooth, use_weight, softmax, onehot_target,
                k_valid, mask_tail):
    """Processes one K tile; accumulates per-class sums in VMEM scratch."""
    k_step = pl.program_id(0)

    @pl.when(k_step == 0)
    def _init():
        inter_acc[...] = jnp.zeros_like(inter_acc)
        psum_acc[...] = jnp.zeros_like(psum_acc)
        csum_acc[...] = jnp.zeros_like(csum_acc)

    y_pred = y_pred_ref[...].astype(jnp.float32)          # [N, C, TK]
    n, c, tk = y_pred.shape

    if softmax:
        m = jnp.max(y_pred, axis=1, keepdims=True)        # softmax over class dim
        e = jnp.exp(y_pred - m)                           # EUP slot
        y_pred = e * pl.reciprocal(jnp.sum(e, axis=1, keepdims=True), approx=True)

    # Mask zero-padded tail columns (only contributes to pred_sum; the label /
    # one-hot paths are already padded with values that never match).
    if mask_tail:
        lane = jax.lax.broadcasted_iota(jnp.int32, (1, 1, tk), 2)
        col_ok = (k_step * tk + lane) < k_valid           # [1, 1, TK]
        pred_for_sum = jnp.where(col_ok, y_pred, 0.0)
    else:
        pred_for_sum = y_pred

    if onehot_target:
        y_onehot = y_true_ref[...].astype(jnp.float32)    # [N, C, TK]
        inter_acc[...] += jnp.sum(y_pred * y_onehot, axis=2)
        csum_acc[...] += jnp.sum(y_onehot, axis=2)
    else:
        labels = y_true_ref[...].astype(jnp.int32)        # [N, TK] (widen in-kernel)
        # Small [C, 1] iota; class id only depends on the C position.
        class_ids = jax.lax.broadcasted_iota(jnp.int32, (c, 1), 0)
        match = labels[:, None, :] == class_ids[None, :, :]        # [N, C, TK] bool
        inter_acc[...] += jnp.sum(jnp.where(match, y_pred, 0.0), axis=2)
        csum_acc[...] += jnp.sum(match.astype(jnp.float32), axis=2)
    psum_acc[...] += jnp.sum(pred_for_sum, axis=2)

    @pl.when(k_step == pl.num_programs(0) - 1)
    def _finalize():
        intersection = inter_acc[...]                     # [N, C]
        class_sum = csum_acc[...]                         # [N, C]
        union = psum_acc[...] + class_sum                 # [N, C] = sum(pred)+sum(onehot)
        if use_weight:
            present = class_sum > 0.0
            w = jnp.where(present,
                          1.0 / jnp.where(present, class_sum * class_sum, 1.0),
                          1.0)                            # inf -> 1.0 (torch semantics)
            inter = jnp.sum(w * intersection, axis=1, keepdims=True)   # [N, 1]
            uni = jnp.sum(w * union, axis=1, keepdims=True)
        else:
            inter = jnp.sum(intersection, axis=1, keepdims=True)
            uni = jnp.sum(union, axis=1, keepdims=True)
        dice = (2.0 * inter + smooth) / (uni + smooth)
        out_ref[...] = 1.0 - dice                         # [N, 1], stored once


def _round_up(x, m):
    return ((x + m - 1) // m) * m


def generalized_dice_loss(y_pred, y_true, *, reduction="mean", smooth=1e-5,
                          use_weight=True, softmax=True, tk_max=2048):
    """JAX/Pallas equivalent of GeneralizedDiceLoss.forward.

    y_pred: [N, C, K] float logits (bf16 accepted; math is f32 in-kernel).
    y_true: [N, K] integer class labels (narrow int dtypes accepted, widened
            in-kernel) or an already-one-hot [N, C, K] target.
    """
    n, c, k = y_pred.shape
    onehot_target = (y_pred.shape == y_true.shape)
    if not onehot_target and y_true.shape != (n, k):
        raise ValueError(
            f"y_true must be [N, K] labels or [N, C, K] one-hot, got {y_true.shape}")
    if not onehot_target and not jnp.issubdtype(y_true.dtype, jnp.integer):
        y_true = y_true.astype(jnp.int32)

    # K tile: biggest multiple of 128 up to tk_max. Default 2048 keeps
    # double-buffered [N, C, TK] f32 blocks well under the v7x 64 MiB / 32 MiB
    # scoped VMEM ceiling at typical segmentation N, C.
    tk = min(_round_up(k, 128), _round_up(tk_max, 128))
    k_pad = _round_up(k, tk)
    if k_pad != k:
        pad = k_pad - k
        y_pred = jnp.pad(y_pred, ((0, 0), (0, 0), (0, pad)))
        if onehot_target:
            y_true = jnp.pad(y_true, ((0, 0), (0, 0), (0, pad)))
        else:
            # Pad with an out-of-range class id so padded columns never match.
            y_true = jnp.pad(y_true, ((0, 0), (0, pad)), constant_values=c)
    num_k_tiles = k_pad // tk

    if onehot_target:
        true_spec = pl.BlockSpec((n, c, tk), lambda kk: (0, 0, kk))
    else:
        true_spec = pl.BlockSpec((n, tk), lambda kk: (0, kk))

    kernel = functools.partial(
        _gdl_kernel, smooth=float(smooth), use_weight=use_weight,
        softmax=softmax, onehot_target=onehot_target,
        k_valid=k, mask_tail=(k_pad != k))

    # TODO(synk): add a "parallel" N (or partial-accumulate K-split) grid axis
    # for v7x megacore; needs per-core partial accumulators / output partition.
    per_sample = pl.pallas_call(
        kernel,
        out_shape=jax.ShapeDtypeStruct((n, 1), jnp.float32),
        grid_spec=pltpu.PrefetchScalarGridSpec(
            num_scalar_prefetch=0,
            grid=(num_k_tiles,),
            in_specs=[pl.BlockSpec((n, c, tk), lambda kk: (0, 0, kk)), true_spec],
            out_specs=pl.BlockSpec((n, 1), lambda kk: (0, 0)),
            scratch_shapes=[pltpu.VMEM((n, c), jnp.float32)] * 3,
        ),
        compiler_params=pltpu.CompilerParams(
            # K is a reduction axis (accumulators + revisited output block).
            dimension_semantics=("arbitrary",),
            vmem_limit_bytes=32 * 1024 * 1024,
        ),
    )(y_pred, y_true)[:, 0]                               # [N]

    if reduction == "mean":
        return jnp.mean(per_sample)
    elif reduction == "sum":
        return jnp.sum(per_sample)
    elif reduction == "none":
        return per_sample
    else:
        raise ValueError(
            f'Unsupported reduction: {reduction}, available options are ["mean", "sum", "none"].')


def _reference_gdl(y_pred, y_true, *, reduction="mean", smooth=1e-5,
                   use_weight=True, softmax=True):
    """Pure-JAX reference mirroring the PyTorch module."""
    y_pred = y_pred.astype(jnp.float32)
    if softmax:
        y_pred = jax.nn.softmax(y_pred, axis=1)
    c = y_pred.shape[1]
    if y_true.shape == y_pred.shape:
        y_onehot = y_true.astype(jnp.float32)
    else:
        y_onehot = jax.nn.one_hot(y_true, c, axis=1, dtype=jnp.float32)
    intersection = jnp.sum(y_pred * y_onehot, axis=2)
    union = jnp.sum(y_pred + y_onehot, axis=2)
    if use_weight:
        class_sum = jnp.sum(y_onehot, axis=2)
        w = 1.0 / (class_sum ** 2)
        w = jnp.where(jnp.isinf(w), 1.0, w)
        intersection = jnp.sum(w * intersection, axis=1)
        union = jnp.sum(w * union, axis=1)
    else:
        intersection = jnp.sum(intersection, axis=1)
        union = jnp.sum(union, axis=1)
    dice = (2.0 * intersection + smooth) / (union + smooth)
    gdl = 1.0 - dice
    if reduction == "mean":
        return jnp.mean(gdl)
    if reduction == "sum":
        return jnp.sum(gdl)
    return gdl


if __name__ == "__main__":
    key = jax.random.PRNGKey(0)
    k_pred, k_true = jax.random.split(key)

    N, C, K = 2, 4, 256
    y_pred = jax.random.normal(k_pred, (N, C, K), dtype=jnp.float32)
    y_true = jax.random.randint(k_true, (N, K), 0, C, dtype=jnp.int32)

    # Integer-label path; force a multi-step K grid (tk_max=128 -> 2 tiles) to
    # exercise init / accumulate / finalize across grid iterations.
    loss = generalized_dice_loss(y_pred, y_true, reduction="mean", tk_max=128)
    loss = jax.block_until_ready(loss)
    ref = _reference_gdl(y_pred, y_true, reduction="mean")
    assert jnp.allclose(loss, ref, atol=1e-3, rtol=1e-3), (loss, ref)

    # Ragged K (padding + in-kernel tail mask), 'none' reduction.
    Kr = 200
    y_pred_r = y_pred[:, :, :Kr]
    y_true_r = y_true[:, :Kr]
    loss_r = generalized_dice_loss(y_pred_r, y_true_r, reduction="none")
    loss_r = jax.block_until_ready(loss_r)
    ref_r = _reference_gdl(y_pred_r, y_true_r, reduction="none")
    assert jnp.allclose(loss_r, ref_r, atol=1e-3, rtol=1e-3), (loss_r, ref_r)

    # Already-one-hot [N, C, K] target path, unweighted, 'sum' reduction.
    y_onehot = jax.nn.one_hot(y_true, C, axis=1, dtype=jnp.float32)
    loss_oh = generalized_dice_loss(y_pred, y_onehot, reduction="sum",
                                    use_weight=False, tk_max=128)
    loss_oh = jax.block_until_ready(loss_oh)
    ref_oh = _reference_gdl(y_pred, y_true, reduction="sum", use_weight=False)
    assert jnp.allclose(loss_oh, ref_oh, atol=1e-3, rtol=1e-3), (loss_oh, ref_oh)

    print("KERNEL_OK")
</pallas_src>

<mosaic_0001>
module attributes {stable_mosaic.version = 11 : i64} {
  func.func @_gdl_kernel(%arg0: i32, %arg1: memref<2x4x128xf32, #tpu.memory_space<vmem>>, %arg2: memref<2x128xi32, #tpu.memory_space<vmem>>, %arg3: memref<2x1xf32, #tpu.memory_space<vmem>>, %arg4: memref<2x4xf32, #tpu.memory_space<vmem>>, %arg5: memref<2x4xf32, #tpu.memory_space<vmem>>, %arg6: memref<2x4xf32, #tpu.memory_space<vmem>>) attributes {dimension_semantics = [#tpu.dimension_semantics<arbitrary>], iteration_bounds = array<i64: 2>, scalar_prefetch = 0 : i64, scratch_operands = 3 : i64, tpu.core_type = #tpu.core_type<tc>, window_params = [{transform_indices = @transform_0, window_bounds = array<i64: 2, 4, 128>}, {transform_indices = @transform_1, window_bounds = array<i64: 2, 128>}, {pipeline_mode = #tpu.pipeline_mode<synchronous>, transform_indices = @transform_2, window_bounds = array<i64: 2, 1>}]} {
    %c0_i32 = arith.constant 0 : i32
    %0 = arith.cmpi eq, %arg0, %c0_i32 : i32
    %1 = arith.extui %0 : i1 to i32
    %c0_i32_0 = arith.constant 0 : i32
    %2 = arith.cmpi ne, %1, %c0_i32_0 : i32
    scf.if %2 {
      %cst_23 = arith.constant 0.000000e+00 : f32
      %40 = vector.broadcast %cst_23 : f32 to vector<2x4xf32>
      %c0_24 = arith.constant 0 : index
      %c0_25 = arith.constant 0 : index
      %41 = vector.load %arg4[%c0_24, %c0_25] : memref<2x4xf32, #tpu.memory_space<vmem>>, vector<2x4xf32>
      tpu.vector_store %arg4[%c0_24, %c0_25], %40 {strides = array<i32>} : memref<2x4xf32, #tpu.memory_space<vmem>>, vector<2x4xf32>,
      %cst_26 = arith.constant 0.000000e+00 : f32
      %42 = vector.broadcast %cst_26 : f32 to vector<2x4xf32>
      %c0_27 = arith.constant 0 : index
      %c0_28 = arith.constant 0 : index
      %43 = vector.load %arg5[%c0_27, %c0_28] : memref<2x4xf32, #tpu.memory_space<vmem>>, vector<2x4xf32>
      tpu.vector_store %arg5[%c0_27, %c0_28], %42 {strides = array<i32>} : memref<2x4xf32, #tpu.memory_space<vmem>>, vector<2x4xf32>,
      %cst_29 = arith.constant 0.000000e+00 : f32
      %44 = vector.broadcast %cst_29 : f32 to vector<2x4xf32>
      %c0_30 = arith.constant 0 : index
      %c0_31 = arith.constant 0 : index
      %45 = vector.load %arg6[%c0_30, %c0_31] : memref<2x4xf32, #tpu.memory_space<vmem>>, vector<2x4xf32>
      tpu.vector_store %arg6[%c0_30, %c0_31], %44 {strides = array<i32>} : memref<2x4xf32, #tpu.memory_space<vmem>>, vector<2x4xf32>,
    } else {
    }
    %c0 = arith.constant 0 : index
    %c0_1 = arith.constant 0 : index
    %c0_2 = arith.constant 0 : index
    %3 = vector.load %arg1[%c0, %c0_1, %c0_2] : memref<2x4x128xf32, #tpu.memory_space<vmem>>, vector<2x4x128xf32>
    %cst = arith.constant dense<0xFF800000> : vector<2x128xf32>
    %4 = vector.multi_reduction <maximumf>, %3, %cst [1] : vector<2x4x128xf32> to vector<2x128xf32>
    %5 = vector.shape_cast %4 : vector<2x128xf32> to vector<2x1x128xf32>
    %6 = vector.broadcast %5 : vector<2x1x128xf32> to vector<2x4x128xf32>
    %7 = arith.subf %3, %6 : vector<2x4x128xf32>
    %8 = math.exp %7 : vector<2x4x128xf32>
    %cst_3 = arith.constant dense<0.000000e+00> : vector<2x128xf32>
    %9 = vector.multi_reduction <add>, %8, %cst_3 [1] : vector<2x4x128xf32> to vector<2x128xf32>
    %10 = vector.shape_cast %9 : vector<2x128xf32> to vector<2x1x128xf32>
    %11 = tpu.reciprocal %10 {approx = true} : vector<2x1x128xf32> -> vector<2x1x128xf32>
    %12 = vector.broadcast %11 : vector<2x1x128xf32> to vector<2x4x128xf32>
    %13 = arith.mulf %8, %12 : vector<2x4x128xf32>
    %c0_4 = arith.constant 0 : index
    %c0_5 = arith.constant 0 : index
    %14 = vector.load %arg2[%c0_4, %c0_5] : memref<2x128xi32, #tpu.memory_space<vmem>>, vector<2x128xi32>
    %15 = tpu.iota {dimensions = array<i32: 0>} : vector<4x1xi32>
    %16 = vector.shape_cast %14 : vector<2x128xi32> to vector<2x1x128xi32>
    %17 = vector.shape_cast %15 : vector<4x1xi32> to vector<1x4x1xi32>
    %18 = vector.broadcast %16 : vector<2x1x128xi32> to vector<2x4x128xi32>
    %19 = vector.broadcast %17 : vector<1x4x1xi32> to vector<2x4x128xi32>
    %20 = arith.cmpi eq, %18, %19 : vector<2x4x128xi32>
    %c0_6 = arith.constant 0 : index
    %c0_7 = arith.constant 0 : index
    %21 = vector.load %arg4[%c0_6, %c0_7] : memref<2x4xf32, #tpu.memory_space<vmem>>, vector<2x4xf32>
    %cst_8 = arith.constant 0.000000e+00 : f32
    %22 = vector.broadcast %cst_8 : f32 to vector<2x4x128xf32>
    %23 = arith.select %20, %13, %22 : vector<2x4x128xi1>, vector<2x4x128xf32>
    %cst_9 = arith.constant dense<0.000000e+00> : vector<2x4xf32>
    %24 = vector.multi_reduction <add>, %23, %cst_9 [2] : vector<2x4x128xf32> to vector<2x4xf32>
    %25 = arith.addf %21, %24 : vector<2x4xf32>
    %c0_10 = arith.constant 0 : index
    %c0_11 = arith.constant 0 : index
    %26 = vector.load %arg4[%c0_10, %c0_11] : memref<2x4xf32, #tpu.memory_space<vmem>>, vector<2x4xf32>
    tpu.vector_store %arg4[%c0_10, %c0_11], %25 {strides = array<i32>} : memref<2x4xf32, #tpu.memory_space<vmem>>, vector<2x4xf32>,
    %c0_12 = arith.constant 0 : index
    %c0_13 = arith.constant 0 : index
    %27 = vector.load %arg6[%c0_12, %c0_13] : memref<2x4xf32, #tpu.memory_space<vmem>>, vector<2x4xf32>
    %28 = arith.extui %20 : vector<2x4x128xi1> to vector<2x4x128xi32>
    %29 = arith.sitofp %28 : vector<2x4x128xi32> to vector<2x4x128xf32>
    %cst_14 = arith.constant dense<0.000000e+00> : vector<2x4xf32>
    %30 = vector.multi_reduction <add>, %29, %cst_14 [2] : vector<2x4x128xf32> to vector<2x4xf32>
    %31 = arith.addf %27, %30 : vector<2x4xf32>
    %c0_15 = arith.constant 0 : index
    %c0_16 = arith.constant 0 : index
    %32 = vector.load %arg6[%c0_15, %c0_16] : memref<2x4xf32, #tpu.memory_space<vmem>>, vector<2x4xf32>
    tpu.vector_store %arg6[%c0_15, %c0_16], %31 {strides = array<i32>} : memref<2x4xf32, #tpu.memory_space<vmem>>, vector<2x4xf32>,
    %c0_17 = arith.constant 0 : index
    %c0_18 = arith.constant 0 : index
    %33 = vector.load %arg5[%c0_17, %c0_18] : memref<2x4xf32, #tpu.memory_space<vmem>>, vector<2x4xf32>
    %cst_19 = arith.constant dense<0.000000e+00> : vector<2x4xf32>
    %34 = vector.multi_reduction <add>, %13, %cst_19 [2] : vector<2x4x128xf32> to vector<2x4xf32>
    %35 = arith.addf %33, %34 : vector<2x4xf32>
    %c0_20 = arith.constant 0 : index
    %c0_21 = arith.constant 0 : index
    %36 = vector.load %arg5[%c0_20, %c0_21] : memref<2x4xf32, #tpu.memory_space<vmem>>, vector<2x4xf32>
    tpu.vector_store %arg5[%c0_20, %c0_21], %35 {strides = array<i32>} : memref<2x4xf32, #tpu.memory_space<vmem>>, vector<2x4xf32>,
    %c1_i32 = arith.constant 1 : i32
    %37 = arith.cmpi eq, %arg0, %c1_i32 : i32
    %38 = arith.extui %37 : i1 to i32
    %c0_i32_22 = arith.constant 0 : i32
    %39 = arith.cmpi ne, %38, %c0_i32_22 : i32
    scf.if %39 {
      %c0_23 = arith.constant 0 : index
      %c0_24 = arith.constant 0 : index
      %40 = vector.load %arg4[%c0_23, %c0_24] : memref<2x4xf32, #tpu.memory_space<vmem>>, vector<2x4xf32>
      %c0_25 = arith.constant 0 : index
      %c0_26 = arith.constant 0 : index
      %41 = vector.load %arg6[%c0_25, %c0_26] : memref<2x4xf32, #tpu.memory_space<vmem>>, vector<2x4xf32>
      %c0_27 = arith.constant 0 : index
      %c0_28 = arith.constant 0 : index
      %42 = vector.load %arg5[%c0_27, %c0_28] : memref<2x4xf32, #tpu.memory_space<vmem>>, vector<2x4xf32>
      %43 = arith.addf %42, %41 : vector<2x4xf32>
      %cst_29 = arith.constant 0.000000e+00 : f32
      %44 = vector.broadcast %cst_29 : f32 to vector<2x4xf32>
      %45 = arith.cmpf ogt, %41, %44 : vector<2x4xf32>
      %46 = arith.mulf %41, %41 : vector<2x4xf32>
      %cst_30 = arith.constant 1.000000e+00 : f32
      %47 = vector.broadcast %cst_30 : f32 to vector<2x4xf32>
      %48 = arith.select %45, %46, %47 : vector<2x4xi1>, vector<2x4xf32>
      %cst_31 = arith.constant 1.000000e+00 : f32
      %49 = vector.broadcast %cst_31 : f32 to vector<2x4xf32>
      %50 = arith.divf %49, %48 : vector<2x4xf32>
      %cst_32 = arith.constant 1.000000e+00 : f32
      %51 = vector.broadcast %cst_32 : f32 to vector<2x4xf32>
      %52 = arith.select %45, %50, %51 : vector<2x4xi1>, vector<2x4xf32>
      %53 = arith.mulf %52, %40 : vector<2x4xf32>
      %cst_33 = arith.constant dense<0.000000e+00> : vector<2xf32>
      %54 = vector.multi_reduction <add>, %53, %cst_33 [1] : vector<2x4xf32> to vector<2xf32>
      %55 = vector.shape_cast %54 : vector<2xf32> to vector<2x1xf32>
      %56 = arith.mulf %52, %43 : vector<2x4xf32>
      %cst_34 = arith.constant dense<0.000000e+00> : vector<2xf32>
      %57 = vector.multi_reduction <add>, %56, %cst_34 [1] : vector<2x4xf32> to vector<2xf32>
      %58 = vector.shape_cast %57 : vector<2xf32> to vector<2x1xf32>
      %cst_35 = arith.constant 2.000000e+00 : f32
      %59 = vector.broadcast %cst_35 : f32 to vector<2x1xf32>
      %60 = arith.mulf %59, %55 : vector<2x1xf32>
      %cst_36 = arith.constant 9.99999974E-6 : f32
      %61 = vector.broadcast %cst_36 : f32 to vector<2x1xf32>
      %62 = arith.addf %60, %61 : vector<2x1xf32>
      %cst_37 = arith.constant 9.99999974E-6 : f32
      %63 = vector.broadcast %cst_37 : f32 to vector<2x1xf32>
      %64 = arith.addf %58, %63 : vector<2x1xf32>
      %65 = arith.divf %62, %64 : vector<2x1xf32>
      %cst_38 = arith.constant 1.000000e+00 : f32
      %66 = vector.broadcast %cst_38 : f32 to vector<2x1xf32>
      %67 = arith.subf %66, %65 : vector<2x1xf32>
      %c0_39 = arith.constant 0 : index
      %c0_40 = arith.constant 0 : index
      %68 = vector.load %arg3[%c0_39, %c0_40] : memref<2x1xf32, #tpu.memory_space<vmem>>, vector<2x1xf32>
      tpu.vector_store %arg3[%c0_39, %c0_40], %67 {strides = array<i32>} : memref<2x1xf32, #tpu.memory_space<vmem>>, vector<2x1xf32>,
    } else {
    }
    return
  }
  func.func @transform_0(%arg0: i32) -> (i32, i32, i32) {
    %c0_i32 = arith.constant 0 : i32
    %c0_i32_0 = arith.constant 0 : i32
    %c0_i32_1 = arith.constant 0 : i32
    return %c0_i32, %c0_i32_0, %arg0 : i32, i32, i32
  }
  func.func @transform_1(%arg0: i32) -> (i32, i32) {
    %c0_i32 = arith.constant 0 : i32
    %c0_i32_0 = arith.constant 0 : i32
    return %c0_i32, %arg0 : i32, i32
  }
  func.func @transform_2(%arg0: i32) -> (i32, i32) {
    %c0_i32 = arith.constant 0 : i32
    %c0_i32_0 = arith.constant 0 : i32
    %c0_i32_1 = arith.constant 0 : i32
    return %c0_i32, %c0_i32_0 : i32, i32
  }
}

</mosaic_0001>

<bundles_post_ra>
// kernel: tpu_custom_call.1
= control target key start
LH: loop header
LB: loop body
LE: loop exit
PB: predicated region body
PF: predicated region fallthrough
CT: control target
= control target key end

     0   :  { %7 = vsyncpa [#allocation6], 0  ;;  %s823_s0 = inlined_call_operand.hbm [shape: f32[2,4,256], index: 0, kind: input, shape index: {}]   ;;  %s824_s1 = inlined_call_operand.hbm [shape: s32[2,256], index: 1, kind: input, shape index: {}]   ;;  %s825_s2 = inlined_call_operand.vmem [shape: f32[2,1], index: 2, kind: output, shape index: {}]  }
   0x1   :  { %9 = vsyncpa [#allocation6 + $0x1], 0 }
   0x2   :  { %10 = vsyncpa [#allocation8], 0 }
   0x3   :  { %12 = vsyncpa [#allocation8 + $0x1], 0  ;;  %s636_s9 = smov 0   ;;  %s638_s10 = smov 0  }
   0x4   :  { %s640_s11 = smov 0   ;;  %s642_s12 = smov 0  }
   0x5 LB: > { %s655_s13 = sadd.s32 4294967295, %s611_s12   ;;  %s658_s14 = sadd.s32 1, %s611_s12   ;;  %s611_s12 = sphi %s642_s12, %s835_s12   ;;  %s607_s11 = sphi %s640_s11, %s834_s11   ;;  %s603_s10 = sphi %s638_s10, %s833_s10   ;;  %s599_s9 = sphi %s636_s9, %s832_s9  }
   0x6   : > { %s22_s15 = ssub.s32 %s611_s12, %s658_s14  ;;  %s25_s16 = sadd.s32 1, %s607_s11 }
   0x7   : > { %p23_p0 = scmp.eq.s32.totalorder %s22_s15, 0  ;;  %p32_p1 = scmp.ne.s32.totalorder %s607_s11, %s603_s10 }
   0x8   : > { %p33_p2 = scmp.eq.s32.totalorder %s611_s12, 0  ;;  %p38_p3 = scmp.ne.s32.totalorder %s603_s10, %s599_s9 }
   0x9   : > { %s668_s17 = scalar_select %p23_p0, %s607_s11, %s25_s16  }
   0xa   : > { %p34_p4 = por %p33_p2, %p32_p1  ;;  %p39_p5 = scmp.eq.s32.totalorder %s655_s13, 0 }
   0xb   : > { %p462_p6 = scmp.lt.s32.totalorder %s611_s12, 2  ;;  %s677_s19 = sand.u32 1, %s607_s11  }
   0xc   : > { %p672_p7 = por %p39_p5, %p38_p3  ;;  %s437_s20 = sshll.u32 %s677_s19, 3 }
   0xd   : > { %s438_s21 = sshll.u32 %s611_s12, 6  ;;  %s113_s25 = scalar_lea.vmem [#allocation5], %s437_s20 }
   0xe   : > { %s827_s18 = scalar_select %p672_p7, 1, 0 }
   0xf   : > { %s684_s24 = scalar_lea.hbm %s823_s0, %s438_s21  ;;  %s119_s26 = sshll.u32 %s113_s25, 4  ;;  %s686_s26 = int_to_ptr.vmem [resolvable:$true] %s119_s26 }
  0x10   : > { %p688_p8 = pnand %p462_p6, %p34_p4  ;;  %s110_s28 = scalar_lea.sflag [#allocation6], %s677_s19 }
  0x11   : > { %s513_s29 = scalar_lea.hbm %s684_s24, 128  ;;  %s518_s4 = scalar_lea.hbm %s823_s0, 256 }
  0x12   : > { %p514_p9 = scmp.ne.s32.totalorder %s684_s24, %s513_s29  ;;  %p515_p10 = pneg %p688_p8 }
  0x13   : > { %p519_p13 = scmp.lt.u32.totalorder %s684_s24, %s823_s0  ;;  %p520_p0 = scmp.lt.u32.totalorder %s518_s4, %s513_s29 }
  0x14   : > { %p516_p11 = pnand %p515_p10, %p514_p9  ;;  %p522_p2 = scmp.lt.u32.totalorder %s513_s29, %s684_s24 }
  0x15   : > { %p521_p1 = por %p520_p0, %p519_p13 }
  0x16   : > { %p517_p12 = pneg %p516_p11 }
  0x17   : > { %p523_p3 = por %p522_p2, %p521_p1 }
  0x19   : > { %p524_p4 = pnand %p523_p3, %p517_p12 }
  0x1b   : > { %527 = shalt.err (!%p524_p4)
}
  0x1c   : > { %s528_s7 = scalar_lea.vmem %s686_s26, 128  ;;  %s613_s8 = smov [#allocation5]  }
  0x1d   : > { %p529_p5 = scmp.ne.s32.totalorder %s686_s26, %s528_s7  ;;  %s533_s9 = sshll.u32 %s613_s8, 4  ;;  %s534_s9 = int_to_ptr.vmem [resolvable:$false] %s533_s9 }
  0x1e   : > { %s535_s15 = scalar_lea.vmem %s534_s9, 256  ;;  %p536_p11 = scmp.lt.s32.totalorder %s686_s26, %s534_s9 }
  0x1f   : > { %p531_p6 = pnand %p529_p5, %p515_p10  ;;  %p537_p13 = scmp.lt.s32.totalorder %s535_s15, %s528_s7 }
  0x21   : > { %p532_p9 = pneg %p531_p6  ;;  %p538_p0 = por %p537_p13, %p536_p11 }
  0x23   : > { %p539_p1 = pnand %p538_p0, %p532_p9 }
  0x25   : > { %542 = shalt.err (!%p539_p1)
}
  0x26   : > { %s614_s16 = smov 128   ;;  %s615_s20 = smov 64  }
  0x27   : > { %s616_s21 = smov 4   ;;  %p441_p12 = scmp.ge.s32.totalorder %s611_s12, 1 }
  0x28   : > { %458 = dma.hbm_to_vmem [thread:$0]  (!%p688_p8), %s684_s24, 128, %s686_s26, %s110_s28, %s614_s16, %s615_s20, %s616_s21  }
  0x29   : > { %p145_p2 = scmp.lt.s32.totalorder %s611_s12, 3  ;;  %s439_s22 = sshll.u32 %s677_s19, 1 }
  0x2a   : > { %s440_s25 = sshll.u32 %s611_s12, 5  ;;  %s133_s29 = scalar_lea.vmem [#allocation7], %s439_s22 }
  0x2b   : > { %p723_p3 = pnand %p441_p12, %p145_p2  ;;  %s140_s30 = sshll.u32 %s133_s29, 4  ;;  %s141_s30 = int_to_ptr.vmem [resolvable:$true] %s140_s30 }
  0x2c   : > { %s731_s5 = scalar_lea.hbm %s824_s1, %s440_s25  ;;  %s130_s24 = scalar_lea.sflag [#allocation8], %s677_s19 }
  0x2d   : > { %s829_s23 = scalar_select %p723_p3, 1, 0 }
  0x2e   : > { %s543_s26 = scalar_lea.hbm %s731_s5, 32  ;;  %s548_s6 = scalar_lea.hbm %s824_s1, 64 }
  0x2f   : > { %p544_p4 = scmp.ne.s32.totalorder %s731_s5, %s543_s26  ;;  %p549_p9 = scmp.lt.u32.totalorder %s731_s5, %s824_s1 }
  0x30   : > { %p550_p11 = scmp.lt.u32.totalorder %s548_s6, %s543_s26  ;;  %p552_p0 = scmp.lt.u32.totalorder %s543_s26, %s731_s5 }
  0x31   : > { %p546_p5 = pnand %p544_p4, %p515_p10 }
  0x32   : > { %p551_p13 = por %p550_p11, %p549_p9 }
  0x33   : > { %p547_p6 = pneg %p546_p5 }
  0x34   : > { %p553_p1 = por %p552_p0, %p551_p13 }
  0x36   : > { %p554_p12 = pnand %p553_p1, %p547_p6 }
  0x38   : > { %557 = shalt.err (!%p554_p12)
}
  0x39   : > { %s558_s19 = scalar_lea.vmem %s141_s30, 32  ;;  %s617_s9 = smov [#allocation7]  }
  0x3a   : > { %p559_p2 = scmp.ne.s32.totalorder %s141_s30, %s558_s19  ;;  %s563_s15 = sshll.u32 %s617_s9, 4  ;;  %s564_s15 = int_to_ptr.vmem [resolvable:$false] %s563_s15 }
  0x3b   : > { %s565_s16 = scalar_lea.vmem %s564_s15, 64  ;;  %p566_p7 = scmp.lt.s32.totalorder %s141_s30, %s564_s15 }
  0x3c   : > { %p561_p4 = pnand %p559_p2, %p515_p10  ;;  %p567_p3 = scmp.lt.s32.totalorder %s565_s16, %s558_s19 }
  0x3e   : > { %p562_p5 = pneg %p561_p4  ;;  %p568_p9 = por %p567_p3, %p566_p7 }
  0x40   : > { %p569_p11 = pnand %p568_p9, %p562_p5 }
  0x42   : > { %572 = shalt.err (!%p569_p11)
}
  0x43   : > { %461 = dma.hbm_to_vmem [thread:$0]  (!%p688_p8), %s731_s5, 32, %s141_s30, %s130_s24  }
  0x44   : > { %p830_p6 = scmp.ne.s32.totalorder %s829_s23, 0 }
  0x45   : > { %s151_s20 = sand.u32 (!%p830_p6), 1, %s603_s10   ;;  %p831_p10 = scmp.ne.s32.totalorder (!%p830_p6), %s827_s18, 0 }
  0x46   : > { %149 = sbr.rel (%p830_p6) target bundleno = 476 (0x1dc), region = 28  ;;  %s442_s21 = sshll.u32 (!%p830_p6), %s151_s20, 3 }
  0x47   : > { %s152_s22 = scalar_lea.sflag (!%p830_p6), [#allocation6], %s151_s20  ;;  %s155_s25 = scalar_lea.vmem (!%p830_p6), [#allocation5], %s442_s21 }
  0x4d   : > { %590 = dma.done.wait (%p831_p10), %s152_s22, 128  }
  0x4e   : > { %592 = vsyncadd (%p831_p10), %s152_s22, 4294967168  ;;  %s443_s29 = sshll.u32 %s151_s20, 1  ;;  %s161_s3 = scalar_lea.sflag [#allocation8], %s151_s20 }
  0x4f   : > { %s164_s27 = scalar_lea.vmem [#allocation7], %s443_s29 }
  0x50   : > { %594 = dma.done.wait (%p831_p10), %s161_s3, 32  }
  0x51   : > { %596 = vsyncadd (%p831_p10), %s161_s3, 4294967264  ;;  %p444_p7 = scmp.ne.s32.totalorder %s655_s13, 0 }
  0x52   : > { %vm189_vm0 = vcmask (!%p444_p7), 25600   ;;  %v618_v0 = vmov (!%p444_p7), 0.0  }
  0x53   : > { %188 = sbr.rel (%p444_p7) target bundleno = 90 (0x5a), region = 40  ;;  %190 = vst.msk [vmem:[#allocation2] sm:$0x3] (!%p444_p7), %vm189_vm0, %v618_v0  ;;  %191 = vst.msk [vmem:[#allocation3] sm:$0x3] (!%p444_p7), %vm189_vm0, %v618_v0 }
  0x54   : > { %192 = vst.msk [vmem:[#allocation4] sm:$0x3] (!%p444_p7), %vm189_vm0, %v618_v0 }
  0x5a PF: > { %vm195_vm1 = vcmask 1043456   ;;  %v235_v1 = vlaneseq  ;;  %v193_v2 = vld [vmem:[%s155_s25] sm:$0xf]  ;;  %v194_v3 = vld [vmem:[%s155_s25 + $0x4] sm:$0xf]  ;;  %v620_v30 = vmov 0.0  }
  0x5b   : > { %v619_v5 = vmov 1966171168   ;;  %v196_v8 = vsel %vm195_vm1, %v193_v2, -inf  ;;  %v203_v11 = vsel %vm195_vm1, %v194_v3, -inf  ;;  %vm290_vm4 = vcmask 1041409   ;;  %p448_p8 = scmp.ne.s32.totalorder %s655_s13, 1 }
  0x5c   : > { %v765_v4 = vshrl.u32 %v235_v1, 7  ;;  %v246_v6 = vunpack.c.l.s4 %v619_v5  ;;  %v281_v7 = vand.u32 127, %v235_v1  ;;  %v445_v9 = vld.sshfl [vmem:[%s164_s27] sm:$0x11 pattern:$0x75316420] }
  0x5d   : > { %v197_v10 = vrot.slane %v196_v8, 4  ;;  %v244_v12 = vcombine.high %v445_v9, %v445_v9  ;;  %v204_v14 = vrot.slane %v203_v11, 4  ;;  %vm294_vm5 = vcmask 25600  }
  0x5e   : > { %v247_v13 = vunpack.c.0.s8 %v246_v6  ;;  %v770_v15 = vsub.s32 %v281_v7, %v765_v4  ;;  %v261_v18 = vsub.s32 0, %v765_v4  ;;  %v296_v7 = vld [vmem:[#allocation4] sm:$0x3]  ;;  %vm370_vm7 = vcmask (!%p448_p8), 1024  }
  0x5f   : > { %v198_v16 = vmax.f32 %v196_v8, %v197_v10  ;;  %v205_v19 = vmax.f32 %v203_v11, %v204_v14  ;;  %v269_v14 = vld [vmem:[#allocation2] sm:$0x3] }
  0x60   : > { %v250_v17 = vsub.s32 %v247_v13, %v765_v4 }
  0x61   : > { %v199_v20 = vrot.slane %v198_v16, 2  ;;  %v206_v23 = vrot.slane %v205_v19, 2 }
  0x62   : > { %v251_v21 = vrot.slane %v445_v9, %v250_v17  ;;  %v258_v22 = vrot.slane %v244_v12, %v250_v17 }
  0x63   : > { %v200_v24 = vmax.f32 %v198_v16, %v199_v20  ;;  %v207_v27 = vmax.f32 %v205_v19, %v206_v23 }
  0x64   : > { %v262_v25 = vrot.slane %v251_v21, %v261_v18  ;;  %v266_v26 = vrot.slane %v258_v22, %v261_v18  ;;  %v321_v21 = vld [vmem:[#allocation3] sm:$0x3] }
  0x65   : > { %v201_v28 = vrot.slane %v200_v24, 1  ;;  %v208_v29 = vrot.slane %v207_v27, 1 }
  0x66   : > { %vm267_vm2 = vcmp.eq.s32.totalorder %v262_v25, %v765_v4  ;;  %vm268_vm3 = vcmp.eq.s32.totalorder %v266_v26, %v765_v4 }
  0x67   : > { %v446_v31 = vsel %vm267_vm2, 1.0, %v620_v30  ;;  %v447_v32 = vsel %vm268_vm3, 1.0, %v620_v30  ;;  %v202_v33 = vmax.f32 %v200_v24, %v201_v28  ;;  %v209_v35 = vmax.f32 %v207_v27, %v208_v29 }
  0x68   : > { %v301_v34 = vsel %vm195_vm1, %v446_v31, 0.0  ;;  %v304_v37 = vsel %vm195_vm1, %v447_v32, 0.0 }
  0x69   : > { %302 = vadd.xlane.f32.xlu1 %v301_v34  ;;  %v210_v36 = vsub.f32 %v193_v2, %v202_v33  ;;  %v211_v38 = vsub.f32 %v194_v3, %v209_v35 }
  0x6b   : > { %v212_v39 = vmul.f32 1.442695, %v210_v36  ;;  %v214_v40 = vmul.f32 1.442695, %v211_v38 }
  0x6d   : > { %305 = vadd.xlane.f32.xlu1 %v304_v37  ;;  %501 = vpow2.f32 %v212_v39 }
  0x6e   : > { %503 = vpow2.f32 %v214_v40 }
  0x77   : > { %v502_v41 = vpop.eup %501 }
  0x78   : > { %v504_v42 = vpop.eup %503  ;;  %v216_v43 = vsel %vm195_vm1, %v502_v41, 0.0 }
  0x79   : > { %v217_v44 = vrot.slane %v216_v43, 4  ;;  %v223_v45 = vsel %vm195_vm1, %v504_v42, 0.0 }
  0x7a   : > { %v224_v46 = vrot.slane %v223_v45, 4 }
  0x7b   : > { %v218_v47 = vadd.f32 %v217_v44, %v216_v43 }
  0x7c   : > { %v225_v48 = vadd.f32 %v224_v46, %v223_v45 }
  0x7d   : > { %v219_v49 = vrot.slane %v218_v47, 2 }
  0x7e   : > { %v226_v50 = vrot.slane %v225_v48, 2 }
  0x7f   : > { %v220_v51 = vadd.f32 %v219_v49, %v218_v47 }
  0x80   : > { %v227_v52 = vadd.f32 %v226_v50, %v225_v48 }
  0x81   : > { %v221_v53 = vrot.slane %v220_v51, 1 }
  0x82   : > { %v228_v54 = vrot.slane %v227_v52, 1 }
  0x83   : > { %v222_v55 = vadd.f32 %v221_v53, %v220_v51 }
  0x84   : > { %v229_v56 = vadd.f32 %v228_v54, %v227_v52 }
  0x85   : > { %505 = vrcp.f32 %v222_v55 }
  0x86   : > { %507 = vrcp.f32 %v229_v56 }
  0x8f   : > { %v506_v57 = vpop.eup %505 }
  0x90   : > { %v508_v58 = vpop.eup %507  ;;  %v232_v59 = vmul.f32 %v506_v57, %v502_v41 }
  0x91   : > { %v233_v60 = vmul.f32 %v508_v58, %v504_v42 }
  0x92   : > { %v270_v61 = vsel %vm267_vm2, %v232_v59, 0.0  ;;  %v322_v2 = vsel %vm195_vm1, %v232_v59, 0.0 }
  0x93   : > { %v272_v62 = vsel %vm195_vm1, %v270_v61, 0.0  ;;  %v271_v63 = vsel %vm268_vm3, %v233_v60, 0.0  ;;  %v325_v0 = vsel %vm195_vm1, %v233_v60, 0.0 }
  0x94   : > { %273 = vadd.xlane.f32.xlu0 %v272_v62  ;;  %326 = vadd.xlane.f32.xlu1 %v325_v0  ;;  %v275_v1 = vsel %vm195_vm1, %v271_v63, 0.0 }
  0x98   : > { %276 = vadd.xlane.f32.xlu0 %v275_v1 }
  0x9c   : > { %323 = vadd.xlane.f32.xlu0 %v322_v2 }
  0xf6   : > { %v303_v3 = vpop.xlane.xlu1 %302 }
  0xf7   : > { %v312_v5 = vrot.slane %v303_v3, %v770_v15 }
  0xfa   : > { %v306_v6 = vpop.xlane.xlu1 %305 }
  0xfb   : > { %v316_v8 = vrot.slane %v306_v6, %v770_v15 }
  0xfd   : > { %v317_v4 = vsel %vm290_vm4, %v316_v8, %v312_v5 }
  0xfe   : > { %v319_v9 = vadd.f32 %v317_v4, %v296_v7 }
 0x100   : > { %320 = vst.msk [vmem:[#allocation4] sm:$0x3] %vm294_vm5, %v319_v9 }
 0x107   : > { %v347_v25 = vld [vmem:[#allocation4] sm:$0x3] (!%p448_p8) }
 0x108   : > { %vm350_vm6 = vcmp.gt.f32.partialorder (!%p448_p8), %v347_v25, 0.0  ;;  %v351_v26 = vmul.f32 (!%p448_p8), %v347_v25, %v347_v25 }
 0x10a   : > { %v352_v27 = vsel (!%p448_p8), %vm350_vm6, %v351_v26, 1.0 }
 0x10b   : > { %509 = vrcp.f32 (!%p448_p8), %v352_v27 }
 0x115   : > { %v510_v31 = vpop.eup (!%p448_p8), %509 }
 0x121   : > { %v274_v10 = vpop.xlane.xlu0 %273  ;;  %v327_v12 = vpop.xlane.xlu1 %326 }
 0x122   : > { %v285_v13 = vrot.slane %v274_v10, %v770_v15  ;;  %v337_v18 = vrot.slane %v327_v12, %v770_v15 }
 0x125   : > { %v277_v11 = vpop.xlane.xlu0 %276 }
 0x126   : > { %v289_v16 = vrot.slane %v277_v11, %v770_v15 }
 0x128   : > { %v291_v17 = vsel %vm290_vm4, %v289_v16, %v285_v13 }
 0x129   : > { %v293_v19 = vadd.f32 %v291_v17, %v269_v14  ;;  %v324_v20 = vpop.xlane.xlu0 %323  ;;  %345 = sbr.rel (%p448_p8) target bundleno = 476 (0x1dc), region = 44 }
 0x12a   : > { %v333_v22 = vrot.slane %v324_v20, %v770_v15  ;;  %v355_v15 = vsel (!%p448_p8), %vm350_vm6, %v510_v31, 1.0 }
 0x12b   : > { %295 = vst.msk [vmem:[#allocation2] sm:$0x3] %vm294_vm5, %v293_v19 }
 0x12c   : > { %v338_v23 = vsel %vm290_vm4, %v337_v18, %v333_v22 }
 0x12d   : > { %v340_v24 = vadd.f32 %v338_v23, %v321_v21 }
 0x12f   : > { %341 = vst.msk [vmem:[#allocation3] sm:$0x3] %vm294_vm5, %v340_v24 }
 0x132   : > { %v346_v30 = vld [vmem:[#allocation2] sm:$0x3] }
 0x133   : > { %v356_v33 = vmul.f32 %v355_v15, %v346_v30 }
 0x135   : > { %v357_v35 = vsel %vm294_vm5, %v356_v33, 0.0 }
 0x136   : > { %v348_v28 = vld [vmem:[#allocation3] sm:$0x3] }
 0x137   : > { %v349_v29 = vadd.f32 %v348_v28, %v347_v25 }
 0x139   : > { %v360_v32 = vmul.f32 %v355_v15, %v349_v29 }
 0x13b   : > { %v361_v34 = vsel %vm294_vm5, %v360_v32, 0.0 }
 0x13c   : > { %362 = vadd.xlane.f32.xlu0 %v361_v34 }
 0x140   : > { %358 = vadd.xlane.f32.xlu0 %v357_v35 }
 0x1c9   : > { %v363_v36 = vpop.xlane.xlu0 %362 }
 0x1ca   : > { %v366_v37 = vadd.f32 1e-05, %v363_v36 }
 0x1cc   : > { %511 = vrcp.f32 %v366_v37 }
 0x1cd   : > { %v359_v38 = vpop.xlane.xlu0 %358 }
 0x1ce   : > { %v364_v39 = vmul.f32 2.0, %v359_v38 }
 0x1d0   : > { %v365_v40 = vadd.f32 1e-05, %v364_v39 }
 0x1d6   : > { %v512_v41 = vpop.eup %511 }
 0x1d7   : > { %v368_v42 = vmul.f32 %v512_v41, %v365_v40 }
 0x1d9   : > { %v369_v43 = vsub.f32 1.0, %v368_v42 }
 0x1db   : > { %371 = vst.msk [vmem:[%s825_s2] sm:$0x3] %vm370_vm7, %v369_v43 }
 0x1dc PF: > { %p15_p3 = scmp.ge.s32.totalorder %s658_s14, 4   ;;  %s832_s9 = smov %s603_s10 }
 0x1dd   : > { %s833_s10 = smov %s607_s11  ;;  %s834_s11 = smov %s668_s17 }
 0x1de   : > { %s835_s12 = smov %s658_s14  ;;  %17 = sbr.rel (!%p15_p3) target bundleno = 5 (0x5), region = 85 }
 0x1e5   :  { %383 = vsyncpa [#allocation6], 1 }
 0x1e6   :  { %385 = vsyncpa [#allocation6 + $0x1], 1 }
 0x1e7   :  { %386 = vsyncpa [#allocation8], 1 }
 0x1e8   :  { %388 = vsyncpa [#allocation8 + $0x1], 1 }

</bundles_post_ra>
